<compile_context>
chip_gen: v7x
topology: tpu7x:2x2x1
jax: 0.10.0
libtpu: 0.0.40
codegen_flags: <defaults>
</compile_context>

<pallas_src>
import functools

import jax
import jax.numpy as jnp
from jax.experimental import pallas as pl
from jax.experimental.pallas import tpu as pltpu


def _round_up(v, m):
    return ((v + m - 1) // m) * m


# ----------------------------------------------------------------------------
# Kernel: one fused MXU contraction per row tile.
# ----------------------------------------------------------------------------
def _linear_param_kernel(x_ref, q_ref, w_ref, o_ref, *, qdim):
    x = x_ref[...]          # (TN, IP) f32, zero-padded past the real in_dim
    q = q_ref[...]          # (TN, QP) f32, zero-padded past the real qdim

    # Khatri-Rao features: z[n, d*IP + i] = q[n, d] * x[n, i]  (Q slabs),
    # then q itself so the bias b_1 folds into the same contraction.
    # Slabs are 128-lane aligned (IP % 128 == 0), so the concat is cheap.
    slabs = [q[:, d:d + 1] * x for d in range(qdim)]
    slabs.append(q)
    z = jnp.concatenate(slabs, axis=1).astype(jnp.bfloat16)   # (TN, Q*IP + QP)

    # Single lane-dense MXU matmul, f32 accumulation.
    o_ref[...] = jnp.dot(
        z, w_ref[...], preferred_element_type=jnp.float32
    ).astype(o_ref.dtype)


# ----------------------------------------------------------------------------
# Wrapper
# ----------------------------------------------------------------------------
def linear_param_forward(x, query_vectors, W_1, b_1, *, row_tile=512):
    """Pallas implementation of Linear_Param.forward(x, query_vectors)."""
    n, in_dim = x.shape
    qdim, w_in, out_dim = W_1.shape
    assert w_in == in_dim
    assert query_vectors.shape == (n, qdim)
    assert b_1.shape == (qdim, out_dim)

    # ---- host-side layout plumbing only (no compute hoisted) -------------
    i_pad = _round_up(in_dim, 128)       # lane-align each Khatri-Rao slab
    q_pad = _round_up(max(qdim, 8), 8)   # small aligned bias slab
    o_pad = _round_up(out_dim, 128)      # lane-dense output stores

    # Row tile: large to amortize per-grid-step overhead, but keep >= 2 grid
    # steps when possible so both TensorCores are used on v7x.
    rt = min(row_tile, max(8, n // 2 if n >= 16 else n))
    rt = max(8, (rt // 8) * 8)
    n_pad = _round_up(n, rt)

    x_p = jnp.zeros((n_pad, i_pad), jnp.float32).at[:n, :in_dim].set(
        x.astype(jnp.float32))
    q_p = jnp.zeros((n_pad, q_pad), jnp.float32).at[:n, :qdim].set(
        query_vectors.astype(jnp.float32))

    # W_flat[(d*IP + i), o] = W_1[d, i, o]; last QP rows carry the bias b_1.
    w_slab = jnp.zeros((qdim, i_pad, o_pad), jnp.float32).at[
        :, :in_dim, :out_dim].set(W_1.astype(jnp.float32))
    b_pad = jnp.zeros((q_pad, o_pad), jnp.float32).at[
        :qdim, :out_dim].set(b_1.astype(jnp.float32))
    w_flat = jnp.concatenate(
        [w_slab.reshape(qdim * i_pad, o_pad), b_pad], axis=0
    ).astype(jnp.bfloat16)                              # (Q*IP + QP, OP)

    k_dim = qdim * i_pad + q_pad
    grid = (n_pad // rt,)

    out = pl.pallas_call(
        functools.partial(_linear_param_kernel, qdim=qdim),
        out_shape=jax.ShapeDtypeStruct((n_pad, o_pad), jnp.float32),
        grid=grid,
        in_specs=[
            pl.BlockSpec((rt, i_pad), lambda i: (i, 0)),
            pl.BlockSpec((rt, q_pad), lambda i: (i, 0)),
            # Constant index_map: fused weight fetched once, VMEM-resident.
            pl.BlockSpec((k_dim, o_pad), lambda i: (0, 0)),
        ],
        out_specs=pl.BlockSpec((rt, o_pad), lambda i: (i, 0)),
        compiler_params=pltpu.CompilerParams(
            dimension_semantics=("parallel",),      # rows independent -> megacore
            vmem_limit_bytes=32 * 1024 * 1024,
        ),
    )(x_p, q_p, w_flat)

    return out[:n, :out_dim]


# ----------------------------------------------------------------------------
# Pure-JAX reference (mirrors the PyTorch forward)
# ----------------------------------------------------------------------------
def linear_param_ref(x, query_vectors, W_1, b_1):
    W = jnp.einsum('nd,dio->nio', query_vectors, W_1,
                   precision=jax.lax.Precision.HIGHEST)
    b = jnp.einsum('nd,do->no', query_vectors, b_1,
                   precision=jax.lax.Precision.HIGHEST)
    out = jnp.einsum('ni,nio->no', x, W,
                     precision=jax.lax.Precision.HIGHEST) + b
    return out


# ----------------------------------------------------------------------------
# Demo / self-test
# ----------------------------------------------------------------------------
if __name__ == "__main__":
    # Small shapes consistent with the module's use in the surrounding model
    # (input_size = 2*hidden+1 = 65, query_vector_dim = 5), with a lane-dense
    # output dim and enough rows to exercise a 2-step grid.
    N, IN_DIM, OUT_DIM, QDIM = 256, 65, 128, 5

    key = jax.random.PRNGKey(0)
    kx, kq, kw, kb = jax.random.split(key, 4)
    x = jax.random.normal(kx, (N, IN_DIM), dtype=jnp.float32)
    q = jax.random.normal(kq, (N, QDIM), dtype=jnp.float32)
    W_1 = (0.1 * jax.random.normal(kw, (QDIM, IN_DIM, OUT_DIM))).astype(jnp.float32)
    b_1 = (0.1 * jax.random.normal(kb, (QDIM, OUT_DIM))).astype(jnp.float32)

    out = linear_param_forward(x, q, W_1, b_1)
    out = jax.block_until_ready(out)
    assert out.shape == (N, OUT_DIM)

    ref = linear_param_ref(x, q, W_1, b_1)
    max_err = float(jnp.max(jnp.abs(out - ref)))
    assert jnp.allclose(out, ref, atol=5e-2, rtol=5e-2), max_err

    print("KERNEL_OK")
</pallas_src>

<mosaic_0001>
module attributes {stable_mosaic.version = 11 : i64} {
  func.func @_linear_param_kernel(%arg0: i32, %arg1: memref<128x128xf32, #tpu.memory_space<vmem>>, %arg2: memref<128x8xf32, #tpu.memory_space<vmem>>, %arg3: memref<648x128xbf16, #tpu.memory_space<vmem>>, %arg4: memref<128x128xf32, #tpu.memory_space<vmem>>) attributes {dimension_semantics = [#tpu.dimension_semantics<parallel>], iteration_bounds = array<i64: 2>, scalar_prefetch = 0 : i64, scratch_operands = 0 : i64, tpu.core_type = #tpu.core_type<tc>, window_params = [{transform_indices = @transform_0, window_bounds = array<i64: 128, 128>}, {transform_indices = @transform_1, window_bounds = array<i64: 128, 8>}, {pipeline_mode = #tpu.pipeline_mode<synchronous>, transform_indices = @transform_2, window_bounds = array<i64: 648, 128>}, {transform_indices = @transform_3, window_bounds = array<i64: 128, 128>}]} {
    %c0 = arith.constant 0 : index
    %c0_0 = arith.constant 0 : index
    %0 = vector.load %arg1[%c0, %c0_0] : memref<128x128xf32, #tpu.memory_space<vmem>>, vector<128x128xf32>
    %c0_1 = arith.constant 0 : index
    %c0_2 = arith.constant 0 : index
    %1 = vector.load %arg2[%c0_1, %c0_2] : memref<128x8xf32, #tpu.memory_space<vmem>>, vector<128x8xf32>
    %2 = vector.extract_strided_slice %1 {offsets = [0, 0], sizes = [128, 1], strides = [1, 1]} : vector<128x8xf32> to vector<128x1xf32>
    %3 = vector.broadcast %2 : vector<128x1xf32> to vector<128x128xf32>
    %4 = arith.mulf %3, %0 : vector<128x128xf32>
    %5 = vector.extract_strided_slice %1 {offsets = [0, 1], sizes = [128, 1], strides = [1, 1]} : vector<128x8xf32> to vector<128x1xf32>
    %6 = vector.broadcast %5 : vector<128x1xf32> to vector<128x128xf32>
    %7 = arith.mulf %6, %0 : vector<128x128xf32>
    %8 = vector.extract_strided_slice %1 {offsets = [0, 2], sizes = [128, 1], strides = [1, 1]} : vector<128x8xf32> to vector<128x1xf32>
    %9 = vector.broadcast %8 : vector<128x1xf32> to vector<128x128xf32>
    %10 = arith.mulf %9, %0 : vector<128x128xf32>
    %11 = vector.extract_strided_slice %1 {offsets = [0, 3], sizes = [128, 1], strides = [1, 1]} : vector<128x8xf32> to vector<128x1xf32>
    %12 = vector.broadcast %11 : vector<128x1xf32> to vector<128x128xf32>
    %13 = arith.mulf %12, %0 : vector<128x128xf32>
    %14 = vector.extract_strided_slice %1 {offsets = [0, 4], sizes = [128, 1], strides = [1, 1]} : vector<128x8xf32> to vector<128x1xf32>
    %15 = vector.broadcast %14 : vector<128x1xf32> to vector<128x128xf32>
    %16 = arith.mulf %15, %0 : vector<128x128xf32>
    %17 = tpu.concatenate %4, %7, %10, %13, %16, %1 in 1 : vector<128x128xf32>, vector<128x128xf32>, vector<128x128xf32>, vector<128x128xf32>, vector<128x128xf32>, vector<128x8xf32> -> vector<128x648xf32>
    %18 = arith.truncf %17 : vector<128x648xf32> to vector<128x648xbf16>
    %c0_3 = arith.constant 0 : index
    %c0_4 = arith.constant 0 : index
    %19 = vector.load %arg3[%c0_3, %c0_4] : memref<648x128xbf16, #tpu.memory_space<vmem>>, vector<648x128xbf16>
    %cst = arith.constant dense<0.000000e+00> : vector<128x128xf32>
    %20 = tpu.matmul %18, %19, %cst {dimension_numbers = #tpu.dot_dimension_numbers<[1], [0], [0], [1], [0, 0, 1, 1], [], []>} : vector<128x648xbf16>, vector<648x128xbf16>, vector<128x128xf32> -> vector<128x128xf32>
    %c0_5 = arith.constant 0 : index
    %c0_6 = arith.constant 0 : index
    %21 = vector.load %arg4[%c0_5, %c0_6] : memref<128x128xf32, #tpu.memory_space<vmem>>, vector<128x128xf32>
    tpu.vector_store %arg4[%c0_5, %c0_6], %20 {strides = array<i32>} : memref<128x128xf32, #tpu.memory_space<vmem>>, vector<128x128xf32>,
    return
  }
  func.func @transform_0(%arg0: i32) -> (i32, i32) {
    %c0_i32 = arith.constant 0 : i32
    %c0_i32_0 = arith.constant 0 : i32
    return %arg0, %c0_i32 : i32, i32
  }
  func.func @transform_1(%arg0: i32) -> (i32, i32) {
    %c0_i32 = arith.constant 0 : i32
    %c0_i32_0 = arith.constant 0 : i32
    return %arg0, %c0_i32 : i32, i32
  }
  func.func @transform_2(%arg0: i32) -> (i32, i32) {
    %c0_i32 = arith.constant 0 : i32
    %c0_i32_0 = arith.constant 0 : i32
    %c0_i32_1 = arith.constant 0 : i32
    return %c0_i32, %c0_i32_0 : i32, i32
  }
  func.func @transform_3(%arg0: i32) -> (i32, i32) {
    %c0_i32 = arith.constant 0 : i32
    %c0_i32_0 = arith.constant 0 : i32
    return %arg0, %c0_i32 : i32, i32
  }
}

</mosaic_0001>

<bundles_post_ra>
// kernel: tpu_custom_call.1
= control target key start
LH: loop header
LB: loop body
LE: loop exit
PB: predicated region body
PF: predicated region fallthrough
CT: control target
= control target key end

     0   :  { %8 = vsyncpa [#allocation3], 0  ;;  %s2509_s0 = inlined_call_operand.vmem [shape: f32[256,128], index: 0, kind: input, shape index: {}]   ;;  %s2510_s1 = inlined_call_operand.vmem [shape: f32[256,8], index: 1, kind: input, shape index: {}]   ;;  %s2511_s2 = inlined_call_operand.hbm [shape: bf16[648,128], index: 2, kind: input, shape index: {}]   ;;  %s2512_s3 = inlined_call_operand.hbm [shape: f32[256,128], index: 3, kind: output, shape index: {}]  }
   0x1   :  { %9 = vsyncpa [#allocation4], 0 }
   0x2   :  { %11 = vsyncpa [#allocation4 + $0x1], 0  ;;  %s1949_s12 = smov 0   ;;  %s1951_s13 = smov 0  }
   0x3   :  { %s1953_s14 = smov 0   ;;  %s1955_s15 = smov 0  }
   0x4 LB: > { %s1970_s16 = sadd.s32 4294967295, %s1916_s15   ;;  %s1466_s17 = sadd.s32 4294967294, %s1916_s15   ;;  %s1916_s15 = sphi %s1955_s15, %s2528_s15   ;;  %s1912_s14 = sphi %s1953_s14, %s2527_s14   ;;  %s1908_s13 = sphi %s1951_s13, %s2526_s13   ;;  %s1904_s12 = sphi %s1949_s12, %s2525_s12  }
   0x5   : > { %s1974_s18 = sadd.s32 1, %s1916_s15   ;;  %s97_s19 = sadd.s32 1, %s1912_s14 }
   0x6   : > { %s94_s20 = ssub.s32 %s1916_s15, %s1974_s18  ;;  %p107_p0 = scmp.ne.s32.totalorder %s1912_s14, %s1908_s13 }
   0x7   : > { %p95_p1 = scmp.eq.s32.totalorder %s94_s20, 0  ;;  %p108_p2 = scmp.eq.s32.totalorder %s1970_s16, 1 }
   0x8   : > { %p113_p3 = scmp.ne.s32.totalorder %s1908_s13, %s1904_s12  ;;  %p114_p4 = scmp.eq.s32.totalorder %s1466_s17, 1 }
   0x9   : > { %s1985_s21 = scalar_select %p95_p1, %s1912_s14, %s97_s19  }
   0xa   : > { %p1987_p5 = por %p108_p2, %p107_p0  ;;  %p1991_p6 = por %p114_p4, %p113_p3 }
   0xb   : > { %p1467_p7 = scmp.ge.s32.totalorder %s1916_s15, 1  ;;  %p121_p8 = scmp.lt.s32.totalorder %s1916_s15, 3 }
   0xc   : > { %s2516_s22 = scalar_select %p1987_p5, 1, 0 }
   0xd   : > { %s2517_s23 = scalar_select %p1991_p6, 1, 0 }
   0xe   : > { %p2513_p9 = scmp.eq.s32.totalorder %s1970_s16, 0  ;;  %p1998_p10 = pnand %p1467_p7, %p121_p8 }
   0xf   : > { %s1918_s25 = smov [#allocation2]   ;;  %s1822_s30 = scalar_lea.hbm %s2511_s2, 5184 }
  0x10   : > { %s2518_s24 = scalar_select %p1998_p10, 1, 0 }
  0x11   : > { %s133_s26 = sshll.u32 %s1918_s25, 4  ;;  %p1684_p11 = pneg %p1998_p10  ;;  %s134_s26 = int_to_ptr.vmem [resolvable:$true] %s133_s26 }
  0x12   : > { %p1823_p13 = scmp.ne.s32.totalorder %s2511_s2, %s1822_s30  ;;  %p1829_p3 = scmp.lt.u32.totalorder %s1822_s30, %s2511_s2 }
  0x13   : > { %p2006_p12 = pnand %p2513_p9, %p1684_p11 }
  0x15   : > { %p1824_p0 = pneg %p2006_p12 }
  0x17   : > { %p1825_p1 = pnand %p1824_p0, %p1823_p13 }
  0x19   : > { %p1826_p2 = pneg %p1825_p1 }
  0x1b   : > { %p1831_p4 = pnand %p1829_p3, %p1826_p2 }
  0x1d   : > { %1834 = shalt.err (!%p1831_p4)
}
  0x1e   : > { %s1835_s8 = scalar_lea.vmem %s134_s26, 5184  ;;  %p1843_p9 = scmp.lt.s32.totalorder %s134_s26, %s134_s26 }
  0x1f   : > { %p1836_p7 = scmp.ne.s32.totalorder %s134_s26, %s1835_s8  ;;  %p1844_p6 = scmp.lt.s32.totalorder %s1835_s8, %s1835_s8 }
  0x21   : > { %p1838_p8 = pnand %p1836_p7, %p1824_p0  ;;  %p1845_p5 = por %p1844_p6, %p1843_p9 }
  0x23   : > { %p1839_p11 = pneg %p1838_p8 }
  0x25   : > { %p1846_p10 = pnand %p1845_p5, %p1839_p11 }
  0x27   : > { %1849 = shalt.err (!%p1846_p10)
}
  0x28   : > { %s1919_s9 = smov 64   ;;  %s1920_s10 = smov 4  }
  0x29   : > { %1687 = dma.hbm_to_vmem [thread:$0]  (!%p2006_p12), %s2511_s2, 5184, %s134_s26, [#allocation3], %s1919_s9, %s1919_s9, %s1920_s10  }
  0x2a   : > { %p2520_p13 = scmp.ne.s32.totalorder %s2518_s24, 0 }
  0x2b   : > { %p2521_p1 = scmp.eq.s32.totalorder (!%p2520_p13), %s1970_s16, 0 }
  0x2c   : > { %167 = sbr.rel (%p2520_p13) target bundleno = 649 (0x289), region = 32 }
  0x33   : > { %1895 = dma.done.wait (%p2521_p1), [#allocation3], 5184   ;;  %p2522_p0 = pmov %p2521_p1 }
  0x34   : > { %s1473_s19 = sshll.u32 %s1970_s16, 4  ;;  %v1921_v0 = vmov 3   ;;  %v1922_v1 = vmov 2   ;;  %v1777_v5 = vld [vmem:[#allocation2 + $0xc0] sm:$0xff]   ;;  %v1779_v8 = vld [vmem:[#allocation2 + $0xc8] sm:$0xff]   ;;  %v1781_v10 = vld [vmem:[#allocation2 + $0xd0] sm:$0xff]  }
  0x35   : > { %1897 = vsyncadd (%p2522_p0), [#allocation3], 4294962112  ;;  %1737 = vset.pattern.permute.xlu1 %v1921_v0  ;;  %1740 = vset.pattern.permute.xlu0 %v1922_v1  ;;  %p197_p5 = scmp.lt.s32.totalorder %s1473_s19, 31  ;;  %v1778_v7 = vld [vmem:[#allocation2 + $0x80] sm:$0xff]   ;;  %v1780_v9 = vld [vmem:[#allocation2 + $0x88] sm:$0xff]   ;;  %v1923_v11 = vmov 0  }
  0x36   : > { %1596 = vmatprep.subr.bf16.mxu1 %v1777_v5  ;;  %v1782_v13 = vld [vmem:[#allocation2 + $0x90] sm:$0xff]   ;;  %v1783_v14 = vld [vmem:[#allocation2 + $0xd8] sm:$0xff]   ;;  %v1785_v16 = vld [vmem:[#allocation2 + $0xe0] sm:$0xff]   ;;  %v1924_v18 = vmov 1   ;;  %v1925_v52 = vmov 4   ;;  %vm1055_vm0 = vcmask 1043456  }
  0x37   : > { %s2530_s19 = smov (!%p197_p5, %s1473_s19), 31  ;;  %1597 = vmatpush3.bf16.msra.mxu1 %v1778_v7  ;;  %v1784_v15 = vld [vmem:[#allocation2 + $0x98] sm:$0xff]   ;;  %v1786_v19 = vld [vmem:[#allocation2 + $0xa0] sm:$0xff]   ;;  %v1787_v21 = vld [vmem:[#allocation2 + $0xe8] sm:$0xff]   ;;  %vm1030_vm1 = vcmask 64512   ;;  %s193_s30 = sand.u32 1, %s1908_s13  }
  0x38   : > { %s1474_s20 = sshll.u32 %s2530_s19, 3  ;;  %1598 = vmatprep.subr.bf16.mxu1 %v1779_v8  ;;  %v1791_v20 = vld [vmem:[#allocation2 + $0x40] sm:$0xff]   ;;  %v1788_v24 = vld [vmem:[#allocation2 + $0xa8] sm:$0xff]   ;;  %v1789_v25 = vld [vmem:[#allocation2 + $0xf0] sm:$0xff]   ;;  %s1472_s4 = sshll.u32 %s193_s30, 7 }
  0x39   : > { %s2043_s26 = scalar_lea.vmem %s2510_s1, %s1474_s20  ;;  %v1792_v22 = vld [vmem:[#allocation2] sm:$0xff]   ;;  %1532 = vmatprep.subr.bf16.mxu0 %v1791_v20  ;;  %v1795_v26 = vld [vmem:[#allocation2 + $0x48] sm:$0xff]   ;;  %v1790_v29 = vld [vmem:[#allocation2 + $0xb0] sm:$0xff]   ;;  %s2183_s29 = scalar_lea.vmem %s2509_s0, %s1474_s20 }
  0x3a   : > { %v2046_v2 = vld [vmem:[%s2043_s26 + $0x8] sm:$0xff]  ;;  %v2049_v3 = vld [vmem:[%s2043_s26] sm:$0xff]  ;;  %v2054_v4 = vld [vmem:[%s2043_s26 + $0x10] sm:$0xff]  ;;  %1533 = vmatpush3.bf16.msra.mxu0 %v1792_v22  ;;  %s2430_s5 = scalar_lea.vmem [#allocation5], %s1472_s4  ;;  %s1531_s6 = sshll.u32 %s1970_s16, 11 }
  0x3b   : > { %423 = vperm.xlu0 %1740, %v2046_v2   ;;  %499 = vperm.xlu1 %1737, %v2049_v3   ;;  %v2059_v6 = vld [vmem:[%s2043_s26 + $0x28] sm:$0xff]  ;;  %v2066_v12 = vld [vmem:[%s2043_s26 + $0x40] sm:$0xff]  ;;  %v2073_v17 = vld [vmem:[%s2043_s26 + $0x18] sm:$0xff]  ;;  %s1380_s7 = sshll.u32 %s2430_s5, 4  ;;  %s2459_s10 = scalar_lea.hbm %s2512_s3, %s1531_s6  ;;  %s2461_s7 = int_to_ptr.vmem [resolvable:$true] %s1380_s7 }
  0x3c   : > { %1599 = vmatpush3.bf16.msra.mxu1 %v1780_v9  ;;  %v2079_v23 = vld [vmem:[%s2043_s26 + $0x30] sm:$0xff]  ;;  %v1796_v27 = vld [vmem:[#allocation2 + $0x8] sm:$0xff]   ;;  %1534 = vmatprep.subr.bf16.mxu0 %v1795_v26  ;;  %v1793_v31 = vld [vmem:[#allocation2 + $0xf8] sm:$0xff]   ;;  %s2468_s16 = scalar_lea.sflag [#allocation4], %s193_s30  ;;  %s1850_s11 = scalar_lea.vmem %s2461_s7, 2048 }
  0x3d   : > { %1600 = vmatprep.subr.bf16.mxu1 %v1781_v10  ;;  %v2084_v28 = vld [vmem:[%s2043_s26 + $0x48] sm:$0xff]  ;;  %v1797_v30 = vld [vmem:[#allocation2 + $0x50] sm:$0xff]   ;;  %v1799_v33 = vld [vmem:[#allocation2 + $0x58] sm:$0xff]   ;;  %p1851_p6 = scmp.ne.s32.totalorder %s2461_s7, %s1850_s11  ;;  %p2523_p9 = scmp.ne.s32.totalorder %s2516_s22, 0 }
  0x3e   : > { %1535 = vmatpush3.bf16.msra.mxu0 %v1796_v27  ;;  %v1798_v32 = vld [vmem:[#allocation2 + $0x10] sm:$0xff]   ;;  %v1800_v34 = vld [vmem:[#allocation2 + $0x18] sm:$0xff]   ;;  %v1801_v36 = vld [vmem:[#allocation2 + $0x60] sm:$0xff]   ;;  %s1926_s17 = smov [#allocation5]  }
  0x3f   : > { %1742 = vset.pattern.permute.xlu0 %v1921_v0  ;;  %503 = vperm.xlu1 %1737, %v2046_v2   ;;  %v1794_v35 = vld [vmem:[#allocation2 + $0xb8] sm:$0xff]   ;;  %v1802_v37 = vld [vmem:[#allocation2 + $0x20] sm:$0xff]   ;;  %v1803_v38 = vld [vmem:[#allocation2 + $0x68] sm:$0xff]   ;;  %p1852_p10 = pnand %p1851_p6, %p2523_p9  ;;  %s1854_s19 = sshll.u32 %s1926_s17, 4  ;;  %s1855_s19 = int_to_ptr.vmem [resolvable:$false] %s1854_s19 }
  0x40   : > { %507 = vperm.xlu0 %1742, %v2054_v4   ;;  %1601 = vmatpush3.bf16.msra.mxu1 %v1782_v13  ;;  %v2098_v39 = vld [vmem:[%s2043_s26 + $0x20] sm:$0xff]  ;;  %v1804_v40 = vld [vmem:[#allocation2 + $0x28] sm:$0xff]   ;;  %v1805_v41 = vld [vmem:[#allocation2 + $0x70] sm:$0xff]   ;;  %s1856_s20 = scalar_lea.vmem %s1855_s19, 4096  ;;  %p1857_p2 = scmp.lt.s32.totalorder %s2461_s7, %s1855_s19 }
  0x41   : > { %1602 = vmatprep.subr.bf16.mxu1 %v1783_v14  ;;  %1536 = vmatprep.subr.bf16.mxu0 %v1797_v30  ;;  %v1806_v42 = vld [vmem:[#allocation2 + $0x30] sm:$0xff]   ;;  %v2103_v43 = vld [vmem:[%s2043_s26 + $0x38] sm:$0xff]  ;;  %v2116_v47 = vld [vmem:[%s2043_s26 + $0x68] sm:$0xff]  ;;  %p1853_p12 = pneg %p1852_p10  ;;  %p1858_p3 = scmp.lt.s32.totalorder %s1856_s20, %s1850_s11 }
  0x42   : > { %1537 = vmatpush3.bf16.msra.mxu0 %v1798_v32  ;;  %v1807_v44 = vld [vmem:[#allocation2 + $0x78] sm:$0xff]   ;;  %v2110_v46 = vld [vmem:[%s2043_s26 + $0x50] sm:$0xff]  ;;  %v2147_v50 = vld [vmem:[%s2043_s26 + $0x60] sm:$0xff] }
  0x43   : > { %1738 = vset.pattern.permute.xlu1 %v1923_v11  ;;  %1538 = vmatprep.subr.bf16.mxu0 %v1799_v33  ;;  %v1808_v45 = vld [vmem:[#allocation2 + $0x38] sm:$0xff]   ;;  %v2140_v49 = vld [vmem:[%s2043_s26 + $0x70] sm:$0xff]  ;;  %v2188_v55 = vld [vmem:[%s2183_s29] sm:$0xff]  ;;  %p1859_p4 = por %p1858_p3, %p1857_p2 }
  0x44   : > { %519 = vperm.xlu0 %1742, %v2059_v6   ;;  %249 = vperm.xlu1 %1738, %v2046_v2   ;;  %v2135_v48 = vld [vmem:[%s2043_s26 + $0x58] sm:$0xff]  ;;  %v2191_v56 = vld [vmem:[%s2183_s29 + $0x8] sm:$0xff]  ;;  %v1809_v10 = vld [vmem:[#allocation2 + $0x100] sm:$0xff]  }
  0x45   : > { %1603 = vmatpush3.bf16.msra.mxu1 %v1784_v15  ;;  %v2152_v51 = vld [vmem:[%s2043_s26 + $0x78] sm:$0xff]  ;;  %p1860_p7 = pnand %p1859_p4, %p1853_p12 }
  0x46   : > { %1604 = vmatprep.subr.bf16.mxu1 %v1785_v16  ;;  %1539 = vmatpush3.bf16.msra.mxu0 %v1800_v34  ;;  %v1810_v16 = vld [vmem:[#allocation2 + $0x108] sm:$0xff]   ;;  %v2218_v22 = vld [vmem:[%s2183_s29 + $0x18] sm:$0xff] }
  0x47   : > { %1540 = vmatprep.subr.bf16.mxu0 %v1801_v36 }
  0x48   : > { %531 = vperm.xlu0 %1742, %v2066_v12   ;;  %1739 = vset.pattern.permute.xlu1 %v1922_v1 }
  0x49   : > { %419 = vperm.xlu1 %1739, %v2049_v3   ;;  %1605 = vmatpush3.bf16.msra.mxu1 %v1786_v19  ;;  %v2212_v19 = vld [vmem:[%s2183_s29 + $0x10] sm:$0xff] }
  0x4a   : > { %1606 = vmatprep.subr.bf16.mxu1 %v1787_v21  ;;  %1541 = vmatpush3.bf16.msra.mxu0 %v1802_v37 }
  0x4b   : > { %1542 = vmatprep.subr.bf16.mxu0 %v1803_v38 }
  0x4c   : > { %1755 = vset.pattern.permute.xlu0 %v1923_v11 }
  0x4d   : > { %244 = vperm.xlu0 %1755, %v2049_v3   ;;  %1741 = vset.pattern.permute.xlu1 %v1924_v18 }
  0x4e   : > { %347 = vperm.xlu1 %1741, %v2054_v4   ;;  %1607 = vmatpush3.bf16.msra.mxu1 %v1788_v24 }
  0x4f   : > { %1608 = vmatprep.subr.bf16.mxu1 %v1789_v25  ;;  %1543 = vmatpush3.bf16.msra.mxu0 %v1804_v40  ;;  %v1812_v40 = vld [vmem:[#allocation2 + $0x118] sm:$0xff]  }
  0x50   : > { %1544 = vmatprep.subr.bf16.mxu0 %v1805_v41 }
  0x51   : > { %259 = vperm.xlu0 %1755, %v2073_v17  }
  0x52   : > { %351 = vperm.xlu1 %1741, %v2073_v17   ;;  %1609 = vmatpush3.bf16.msra.mxu1 %v1790_v29  ;;  %v1811_v29 = vld [vmem:[#allocation2 + $0x110] sm:$0xff]  }
  0x53   : > { %1610 = vmatprep.subr.bf16.mxu1 %v1793_v31  ;;  %1545 = vmatpush3.bf16.msra.mxu0 %v1806_v42 }
  0x54   : > { %1546 = vmatprep.subr.bf16.mxu0 %v1807_v44 }
  0x55   : > { %274 = vperm.xlu0 %1755, %v2079_v23  }
  0x56   : > { %1743 = vset.pattern.permute.xlu1 %v1921_v0  ;;  %1611 = vmatpush3.bf16.msra.mxu1 %v1794_v35 }
  0x57   : > { %511 = vperm.xlu1 %1743, %v2073_v17   ;;  %1660 = vmatprep.subr.bf16.mxu1 %v1923_v11 }
  0x58   : > { %1547 = vmatpush3.bf16.msra.mxu0 %v1808_v45 }
  0x59   : > { %289 = vperm.xlu0 %1755, %v2084_v28   ;;  %1253 = vmatprep.subr.bf16.mxu0 %v1923_v11 }
  0x5b   : > { %1744 = vset.pattern.permute.xlu1 %v1923_v11 }
  0x5c   : > { %254 = vperm.xlu1 %1744, %v2054_v4  }
  0x5d   : > { %1758 = vset.pattern.permute.xlu0 %v1924_v18 }
  0x5e   : > { %339 = vperm.xlu0 %1758, %v2049_v3  }
  0x60   : > { %1745 = vset.pattern.permute.xlu1 %v1922_v1 }
  0x61   : > { %427 = vperm.xlu1 %1745, %v2054_v4  }
  0x62   : > { %343 = vperm.xlu0 %1758, %v2046_v2  }
  0x65   : > { %431 = vperm.xlu1 %1745, %v2073_v17  }
  0x66   : > { %355 = vperm.xlu0 %1758, %v2098_v39  }
  0x69   : > { %1746 = vset.pattern.permute.xlu1 %v1924_v18 }
  0x6a   : > { %359 = vperm.xlu1 %1746, %v2059_v6   ;;  %367 = vperm.xlu0 %1758, %v2103_v43  }
  0x6e   : > { %1747 = vset.pattern.permute.xlu1 %v1921_v0  ;;  %379 = vperm.xlu0 %1758, %v2110_v46  }
  0x6f   : > { %515 = vperm.xlu1 %1747, %v2098_v39  }
  0x72   : > { %391 = vperm.xlu0 %1758, %v2116_v47  }
  0x73   : > { %1748 = vset.pattern.permute.xlu1 %v1923_v11 }
  0x74   : > { %264 = vperm.xlu1 %1748, %v2098_v39  }
  0x76   : > { %1765 = vset.pattern.permute.xlu0 %v1922_v1 }
  0x77   : > { %435 = vperm.xlu0 %1765, %v2098_v39  }
  0x78   : > { %269 = vperm.xlu1 %1748, %v2059_v6  }
  0x7b   : > { %447 = vperm.xlu0 %1765, %v2103_v43  }
  0x7c   : > { %1749 = vset.pattern.permute.xlu1 %v1922_v1 }
  0x7d   : > { %439 = vperm.xlu1 %1749, %v2059_v6  }
  0x7f   : > { %459 = vperm.xlu0 %1765, %v2110_v46  }
  0x81   : > { %1750 = vset.pattern.permute.xlu1 %v1924_v18 }
  0x82   : > { %363 = vperm.xlu1 %1750, %v2079_v23  }
  0x83   : > { %471 = vperm.xlu0 %1765, %v2116_v47  }
  0x86   : > { %1751 = vset.pattern.permute.xlu1 %v1921_v0 }
  0x87   : > { %523 = vperm.xlu1 %1751, %v2079_v23   ;;  %1769 = vset.pattern.permute.xlu0 %v1921_v0 }
  0x88   : > { %543 = vperm.xlu0 %1769, %v2135_v48  }
  0x8b   : > { %527 = vperm.xlu1 %1751, %v2103_v43  }
  0x8c   : > { %555 = vperm.xlu0 %1769, %v2140_v49  }
  0x8f   : > { %1752 = vset.pattern.permute.xlu1 %v1923_v11 }
  0x90   : > { %279 = vperm.xlu1 %1752, %v2103_v43   ;;  %1771 = vset.pattern.permute.xlu0 %v1923_v11 }
  0x91   : > { %304 = vperm.xlu0 %1771, %v2147_v50  }
  0x94   : > { %1753 = vset.pattern.permute.xlu1 %v1922_v1 }
  0x95   : > { %443 = vperm.xlu1 %1753, %v2079_v23   ;;  %319 = vperm.xlu0 %1771, %v2152_v51  }
  0x99   : > { %1754 = vset.pattern.permute.xlu1 %v1924_v18  ;;  %1775 = vset.pattern.permute.xlu0 %v1925_v52 }
  0x9a   : > { %371 = vperm.xlu1 %1754, %v2066_v12   ;;  %579 = vperm.xlu0 %1775, %v2049_v3  }
  0x9e   : > { %375 = vperm.xlu1 %1754, %v2084_v28   ;;  %615 = vperm.xlu0 %1775, %v2084_v28  }
  0xa2   : > { %1756 = vset.pattern.permute.xlu1 %v1921_v0  ;;  %591 = vperm.xlu0 %1775, %v2073_v17  }
  0xa3   : > { %535 = vperm.xlu1 %1756, %v2084_v28  }
  0xa6   : > { %623 = vperm.xlu0 %1775, %v2135_v48  }
  0xa7   : > { %1757 = vset.pattern.permute.xlu1 %v1923_v11 }
  0xa8   : > { %284 = vperm.xlu1 %1757, %v2066_v12  }
  0xaa   : > { %599 = vperm.xlu0 %1775, %v2059_v6  }
  0xac   : > { %1759 = vset.pattern.permute.xlu1 %v1922_v1 }
  0xad   : > { %451 = vperm.xlu1 %1759, %v2066_v12  }
  0xae   : > { %631 = vperm.xlu0 %1775, %v2116_v47  }
  0xb1   : > { %455 = vperm.xlu1 %1759, %v2084_v28  }
  0xb2   : > { %607 = vperm.xlu0 %1775, %v2103_v43  }
  0xb5   : > { %1760 = vset.pattern.permute.xlu1 %v1924_v18 }
  0xb6   : > { %383 = vperm.xlu1 %1760, %v2135_v48   ;;  %639 = vperm.xlu0 %1775, %v2152_v51  }
  0xba   : > { %1761 = vset.pattern.permute.xlu1 %v1921_v0  ;;  %v500_v53 = vpop.permute.xlu1 %499  ;;  %v424_v54 = vpop.permute.xlu0 %423 }
  0xbb   : > { %539 = vperm.xlu1 %1761, %v2110_v46   ;;  %v562_v58 = vmul.f32 %v500_v53, %v2188_v55  ;;  %v483_v3 = vmul.f32 %v424_v54, %v2191_v56 }
  0xbe   : > { %v504_v57 = vpop.permute.xlu1 %503 }
  0xbf   : > { %v563_v59 = vmul.f32 %v504_v57, %v2191_v56  ;;  %1762 = vset.pattern.permute.xlu1 %v1923_v11  ;;  %v508_v60 = vpop.permute.xlu0 %507 }
  0xc0   : > { %294 = vperm.xlu1 %1762, %v2110_v46   ;;  %v564_v21 = vmul.f32 %v508_v60, %v2212_v19 }
  0xc1   : > { %v661_v61 = vpack.c.bf16 %v563_v59, %v562_v58  ;;  %v2241_v59 = vld [vmem:[%s2183_s29 + $0x28] sm:$0xff] }
  0xc3   : > { %v250_v62 = vpop.permute.xlu1 %249  ;;  %1188 = vmatprep.mubr.bf16.mxu1 %v661_v61  ;;  %v2197_v63 = vpop.permute.xlu0 %519  ;;  %v2244_v61 = vld [vmem:[%s2183_s29 + $0x20] sm:$0xff] }
  0xc4   : > { %299 = vperm.xlu1 %1762, %v2135_v48   ;;  %v323_v38 = vmul.f32 %v250_v62, %v2191_v56  ;;  %v1813_v62 = vld [vmem:[#allocation2 + $0x120] sm:$0xff]  }
  0xc7   : > { %v2201_v5 = vpop.permute.xlu0 %531 }
  0xc8   : > { %1763 = vset.pattern.permute.xlu1 %v1922_v1  ;;  %v420_v6 = vpop.permute.xlu1 %419 }
  0xc9   : > { %v482_v7 = vmul.f32 %v420_v6, %v2188_v55  ;;  %463 = vperm.xlu1 %1763, %v2135_v48  }
  0xcb   : > { %v660_v8 = vpack.c.bf16 %v483_v3, %v482_v7 }
  0xcc   : > { %v245_v9 = vpop.permute.xlu0 %244 }
  0xcd   : > { %1764 = vset.pattern.permute.xlu1 %v1924_v18  ;;  %v348_v13 = vpop.permute.xlu1 %347  ;;  %1189 = vmatmul.mubr.bf16.vlgmr.msra.gmra.mrb[0].mxu1 %v660_v8  ;;  %v322_v34 = vmul.f32 %v245_v9, %v2188_v55 }
  0xce   : > { %387 = vperm.xlu1 %1764, %v2147_v50   ;;  %1669 = vmatpush1.bf16.msra.mxu1 %v1809_v10  ;;  %v404_v41 = vmul.f32 %v348_v13, %v2212_v19 }
  0xcf   : > { %1661 = vmatprep.subr.bf16.mxu1 %v1923_v11  ;;  %v658_v45 = vpack.c.bf16 %v323_v38, %v322_v34  ;;  %v2283_v38 = vld [vmem:[%s2183_s29 + $0x30] sm:$0xff] }
  0xd0   : > { %v260_v14 = vpop.permute.xlu0 %259 }
  0xd1   : > { %v352_v15 = vpop.permute.xlu1 %351  ;;  %v325_v3 = vmul.f32 %v260_v14, %v2218_v22 }
  0xd2   : > { %1766 = vset.pattern.permute.xlu1 %v1921_v0  ;;  %1670 = vmatpush1.bf16.msra.mxu1 %v1810_v16  ;;  %v405_v36 = vmul.f32 %v352_v15, %v2218_v22 }
  0xd3   : > { %547 = vperm.xlu1 %1766, %v2147_v50   ;;  %1662 = vmatprep.subr.bf16.mxu1 %v1923_v11 }
  0xd4   : > { %v2214_v20 = vpop.permute.xlu0 %274  ;;  %v665_v58 = vpack.c.bf16 %v405_v36, %v404_v41  ;;  %v2277_v36 = vld [vmem:[%s2183_s29 + $0x38] sm:$0xff] }
  0xd6   : > { %v512_v24 = vpop.permute.xlu1 %511  ;;  %1671 = vmatpush1.bf16.msra.mxu1 %v1811_v29 }
  0xd7   : > { %v565_v25 = vmul.f32 %v512_v24, %v2218_v22  ;;  %551 = vperm.xlu1 %1766, %v2116_v47   ;;  %1663 = vmatprep.subr.bf16.mxu1 %v1923_v11 }
  0xd8   : > { %v2223_v26 = vpop.permute.xlu0 %289 }
  0xd9   : > { %v667_v27 = vpack.c.bf16 %v565_v25, %v564_v21 }
  0xda   : > { %1672 = vmatpush1.bf16.msra.mxu1 %v1812_v40 }
  0xdb   : > { %1767 = vset.pattern.permute.xlu1 %v1923_v11  ;;  %v255_v30 = vpop.permute.xlu1 %254  ;;  %1196 = vmatprep.mubr.bf16.mxu1 %v667_v27  ;;  %v1814_v27 = vld [vmem:[#allocation2 + $0x128] sm:$0xff]  }
  0xdc   : > { %309 = vperm.xlu1 %1767, %v2116_v47   ;;  %1664 = vmatprep.subr.bf16.mxu1 %v1923_v11 }
  0xdd   : > { %v340_v31 = vpop.permute.xlu0 %339 }
  0xde   : > { %v402_v32 = vmul.f32 %v340_v31, %v2188_v55  ;;  %1673 = vmatpush1.bf16.msra.mxu1 %v1813_v62 }
  0xdf   : > { %1665 = vmatprep.subr.bf16.mxu1 %v1923_v11 }
  0xe0   : > { %1768 = vset.pattern.permute.xlu1 %v1922_v1  ;;  %v428_v33 = vpop.permute.xlu1 %427 }
  0xe1   : > { %v344_v35 = vpop.permute.xlu0 %343  ;;  %467 = vperm.xlu1 %1768, %v2147_v50   ;;  %v484_v53 = vmul.f32 %v428_v33, %v2212_v19 }
  0xe2   : > { %v403_v37 = vmul.f32 %v344_v35, %v2191_v56  ;;  %1674 = vmatpush1.bf16.msra.mxu1 %v1814_v27 }
  0xe3   : > { %1666 = vmatprep.subr.bf16.mxu1 %v1923_v11 }
  0xe4   : > { %v432_v42 = vpop.permute.xlu1 %431  ;;  %v659_v44 = vpack.c.bf16 %v403_v37, %v402_v32  ;;  %v1815_v32 = vld [vmem:[#allocation2 + $0x130] sm:$0xff]   ;;  %v1816_v37 = vld [vmem:[#allocation2 + $0x138] sm:$0xff]  }
  0xe5   : > { %v485_v54 = vmul.f32 %v432_v42, %v2218_v22  ;;  %1770 = vset.pattern.permute.xlu1 %v1924_v18  ;;  %v356_v57 = vpop.permute.xlu0 %355  ;;  %v324_v18 = vmul.f32 %v255_v30, %v2212_v19  ;;  %v1817_v42 = vld [vmem:[#allocation2 + $0x140] ss:$0 sps:$4 sm:$0xff]  }
  0xe6   : > { %395 = vperm.xlu1 %1770, %v2140_v49   ;;  %1091 = vmatprep.mubr.bf16.mxu0 %v659_v44  ;;  %v406_v8 = vmul.f32 %v356_v57, %v2244_v61 }
  0xe7   : > { %v666_v60 = vpack.c.bf16 %v485_v54, %v484_v53  ;;  %1092 = vmatmul.mubr.bf16.vlgmr.msra.gmra.mrb[0].mxu0 %v658_v45  ;;  %v664_v13 = vpack.c.bf16 %v325_v3, %v324_v18  ;;  %1675 = vmatpush1.bf16.msra.mxu1 %v1815_v32  ;;  %v1057_v53 = vsel %vm1055_vm0, %v1817_v42, 0 }
  0xe8   : > { %1099 = vmatprep.mubr.bf16.mxu0 %v665_v58  ;;  %1254 = vmatpush1.bf16.msra.mxu0 %v1809_v10  ;;  %v567_v10 = vmul.f32 %v2197_v63, %v2241_v59 }
  0xe9   : > { %v360_v6 = vpop.permute.xlu1 %359  ;;  %1197 = vmatmul.mubr.bf16.gmra.mrb[4].mxu1 %v666_v60  ;;  %v368_v7 = vpop.permute.xlu0 %367  ;;  %1255 = vmatprep.subr.bf16.mxu0 %v1923_v11 }
  0xea   : > { %v407_v9 = vmul.f32 %v360_v6, %v2241_v59  ;;  %399 = vperm.xlu1 %1770, %v2152_v51   ;;  %1667 = vmatprep.subr.bf16.mxu1 %v1923_v11  ;;  %v409_v41 = vmul.f32 %v368_v7, %v2277_v36 }
  0xeb   : > { %1676 = vmatpush1.bf16.msra.mxu1 %v1816_v37 }
  0xec   : > { %1256 = vmatpush1.bf16.msra.mxu0 %v1810_v16  ;;  %v671_v15 = vpack.c.bf16 %v407_v9, %v406_v8  ;;  %1668 = vmatprep.subr.bf16.mxu1 %v1923_v11 }
  0xed   : > { %v2256_v14 = vpop.permute.xlu0 %379  ;;  %1257 = vmatprep.subr.bf16.mxu0 %v1923_v11 }
  0xee   : > { %1772 = vset.pattern.permute.xlu1 %v1921_v0  ;;  %v516_v21 = vpop.permute.xlu1 %515 }
  0xef   : > { %v566_v24 = vmul.f32 %v516_v21, %v2244_v61  ;;  %559 = vperm.xlu1 %1772, %v2152_v51   ;;  %1100 = vmatmul.mubr.bf16.gmra.mrb[4].mxu0 %v664_v13  ;;  %v2309_v13 = vld [vmem:[%s2183_s29 + $0x48] sm:$0xff] }
  0xf0   : > { %1107 = vmatprep.mubr.bf16.mxu0 %v671_v15  ;;  %1258 = vmatpush1.bf16.msra.mxu0 %v1811_v29 }
  0xf1   : > { %v673_v16 = vpack.c.bf16 %v567_v10, %v566_v24  ;;  %1259 = vmatprep.subr.bf16.mxu0 %v1923_v11  ;;  %v2263_v63 = vpop.permute.xlu0 %391  ;;  %1677 = vmatpush1.bf16.msra.mxu1 %v1057_v53  ;;  %v2306_v10 = vld [vmem:[%s2183_s29 + $0x40] sm:$0xff] }
  0xf3   : > { %1773 = vset.pattern.permute.xlu1 %v1923_v11  ;;  %v265_v25 = vpop.permute.xlu1 %264  ;;  %1204 = vmatprep.mubr.bf16.mxu1 %v673_v16 }
  0xf4   : > { %314 = vperm.xlu1 %1773, %v2140_v49   ;;  %1260 = vmatpush1.bf16.msra.mxu0 %v1812_v40  ;;  %v326_v29 = vmul.f32 %v265_v25, %v2244_v61 }
  0xf5   : > { %1261 = vmatprep.subr.bf16.mxu0 %v1923_v11 }
  0xf6   : > { %v436_v31 = vpop.permute.xlu0 %435 }
  0xf7   : > { %v270_v0 = vpop.permute.xlu1 %269  ;;  %v486_v34 = vmul.f32 %v436_v31, %v2244_v61 }
  0xf8   : > { %v327_v30 = vmul.f32 %v270_v0, %v2241_v59  ;;  %1774 = vset.pattern.permute.xlu1 %v1922_v1  ;;  %1262 = vmatpush1.bf16.msra.mxu0 %v1813_v62  ;;  %v328_v62 = vmul.f32 %v2214_v20, %v2283_v38 }
  0xf9   : > { %475 = vperm.xlu1 %1774, %v2140_v49   ;;  %1263 = vmatprep.subr.bf16.mxu0 %v1923_v11 }
  0xfa   : > { %v670_v33 = vpack.c.bf16 %v327_v30, %v326_v29  ;;  %v448_v18 = vpop.permute.xlu0 %447  ;;  %v331_v30 = vmul.f32 %v2223_v26, %v2309_v13 }
  0xfb   : > { %v489_v6 = vmul.f32 %v448_v18, %v2277_v36 }
  0xfc   : > { %v440_v35 = vpop.permute.xlu1 %439  ;;  %1108 = vmatmul.mubr.bf16.gmra.mrb[8].mxu0 %v670_v33 }
  0xfd   : > { %v487_v1 = vmul.f32 %v440_v35, %v2241_v59  ;;  %479 = vperm.xlu1 %1774, %v2152_v51   ;;  %1264 = vmatpush1.bf16.msra.mxu0 %v1814_v27  ;;  %v570_v27 = vmul.f32 %v2201_v5, %v2306_v10 }
  0xfe   : > { %1265 = vmatprep.subr.bf16.mxu0 %v1923_v11 }
  0xff   : > { %v672_v40 = vpack.c.bf16 %v487_v1, %v486_v34  ;;  %v460_v34 = vpop.permute.xlu0 %459 }
 0x101   : > { %1776 = vset.pattern.permute.xlu1 %v1925_v52  ;;  %v364_v44 = vpop.permute.xlu1 %363  ;;  %1205 = vmatmul.mubr.bf16.gmra.mrb[8].mxu1 %v672_v40  ;;  %v2321_v40 = vld [vmem:[%s2183_s29 + $0x50] sm:$0xff] }
 0x102   : > { %v408_v45 = vmul.f32 %v364_v44, %v2283_v38  ;;  %583 = vperm.xlu1 %1776, %v2046_v2   ;;  %1266 = vmatpush1.bf16.msra.mxu0 %v1815_v32  ;;  %v2326_v44 = vld [vmem:[%s2183_s29 + $0x58] sm:$0xff]  ;;  %v412_v26 = vmul.f32 %v2256_v14, %v2321_v40 }
 0x103   : > { %1267 = vmatprep.subr.bf16.mxu0 %v1923_v11 }
 0x104   : > { %v677_v54 = vpack.c.bf16 %v409_v41, %v408_v45 }
 0x106   : > { %611 = vperm.xlu1 %1776, %v2066_v12   ;;  %v524_v57 = vpop.permute.xlu1 %523  ;;  %1115 = vmatprep.mubr.bf16.mxu0 %v677_v54 }
 0x107   : > { %1268 = vmatpush1.bf16.msra.mxu0 %v1816_v37  ;;  %v568_v58 = vmul.f32 %v524_v57, %v2283_v38  ;;  %v472_v37 = vpop.permute.xlu0 %471 }
 0x108   : > { %1269 = vmatprep.subr.bf16.mxu0 %v1923_v11 }
 0x10a   : > { %587 = vperm.xlu1 %1776, %v2054_v4   ;;  %v528_v52 = vpop.permute.xlu1 %527 }
 0x10b   : > { %v569_v2 = vmul.f32 %v528_v52, %v2277_v36  ;;  %1270 = vmatpush1.bf16.msra.mxu0 %v1057_v53  ;;  %v544_v54 = vpop.permute.xlu0 %543 }
 0x10c   : > { %v573_v52 = vmul.f32 %v544_v54, %v2326_v44 }
 0x10d   : > { %v679_v60 = vpack.c.bf16 %v569_v2, %v568_v58 }
 0x10e   : > { %619 = vperm.xlu1 %1776, %v2110_v46  }
 0x10f   : > { %v280_v3 = vpop.permute.xlu1 %279  ;;  %1212 = vmatprep.mubr.bf16.mxu1 %v679_v60 }
 0x110   : > { %v329_v11 = vmul.f32 %v280_v3, %v2277_v36 }
 0x112   : > { %v676_v4 = vpack.c.bf16 %v329_v11, %v328_v62  ;;  %595 = vperm.xlu1 %1776, %v2098_v39  }
 0x114   : > { %v444_v7 = vpop.permute.xlu1 %443  ;;  %1116 = vmatmul.mubr.bf16.gmra.mrb[12].mxu0 %v676_v4  ;;  %v492_v4 = vmul.f32 %v460_v34, %v2321_v40 }
 0x115   : > { %v488_v8 = vmul.f32 %v444_v7, %v2283_v38 }
 0x116   : > { %627 = vperm.xlu1 %1776, %v2147_v50  }
 0x117   : > { %v678_v20 = vpack.c.bf16 %v489_v6, %v488_v8  ;;  %v2338_v8 = vld [vmem:[%s2183_s29 + $0x68] sm:$0xff] }
 0x119   : > { %v372_v9 = vpop.permute.xlu1 %371  ;;  %1213 = vmatmul.mubr.bf16.gmra.mrb[12].mxu1 %v678_v20 }
 0x11a   : > { %603 = vperm.xlu1 %1776, %v2079_v23   ;;  %v410_v21 = vmul.f32 %v372_v9, %v2306_v10  ;;  %v2341_v9 = vld [vmem:[%s2183_s29 + $0x60] sm:$0xff] }
 0x11d   : > { %v376_v15 = vpop.permute.xlu1 %375 }
 0x11e   : > { %v411_v24 = vmul.f32 %v376_v15, %v2309_v13  ;;  %635 = vperm.xlu1 %1776, %v2140_v49  }
 0x120   : > { %v683_v16 = vpack.c.bf16 %v411_v24, %v410_v21  ;;  %v415_v21 = vmul.f32 %v2263_v63, %v2338_v8 }
 0x122   : > { %v536_v25 = vpop.permute.xlu1 %535  ;;  %1123 = vmatprep.mubr.bf16.mxu0 %v683_v16 }
 0x123   : > { %v571_v0 = vmul.f32 %v536_v25, %v2309_v13  ;;  %v556_v25 = vpop.permute.xlu0 %555 }
 0x125   : > { %v685_v29 = vpack.c.bf16 %v571_v0, %v570_v27 }
 0x127   : > { %v285_v31 = vpop.permute.xlu1 %284  ;;  %1220 = vmatprep.mubr.bf16.mxu1 %v685_v29 }
 0x128   : > { %v330_v32 = vmul.f32 %v285_v31, %v2306_v10  ;;  %v305_v31 = vpop.permute.xlu0 %304 }
 0x12a   : > { %v682_v33 = vpack.c.bf16 %v331_v30, %v330_v32 }
 0x12c   : > { %v452_v35 = vpop.permute.xlu1 %451  ;;  %1124 = vmatmul.mubr.bf16.gmra.mrb[16].mxu0 %v682_v33  ;;  %v334_v33 = vmul.f32 %v305_v31, %v2341_v9 }
 0x12d   : > { %v490_v5 = vmul.f32 %v452_v35, %v2306_v10 }
 0x130   : > { %v456_v1 = vpop.permute.xlu1 %455 }
 0x131   : > { %v491_v41 = vmul.f32 %v456_v1, %v2309_v13 }
 0x133   : > { %v684_v42 = vpack.c.bf16 %v491_v41, %v490_v5  ;;  %v495_v5 = vmul.f32 %v472_v37, %v2338_v8 }
 0x135   : > { %v384_v45 = vpop.permute.xlu1 %383  ;;  %1221 = vmatmul.mubr.bf16.gmra.mrb[16].mxu1 %v684_v42 }
 0x136   : > { %v413_v53 = vmul.f32 %v384_v45, %v2326_v44  ;;  %v2353_v45 = vld [vmem:[%s2183_s29 + $0x70] sm:$0xff] }
 0x137   : > { %v576_v37 = vmul.f32 %v556_v25, %v2353_v45 }
 0x138   : > { %v689_v57 = vpack.c.bf16 %v413_v53, %v412_v26  ;;  %v2356_v53 = vld [vmem:[%s2183_s29 + $0x78] sm:$0xff] }
 0x13a   : > { %v540_v58 = vpop.permute.xlu1 %539  ;;  %1131 = vmatprep.mubr.bf16.mxu0 %v689_v57 }
 0x13b   : > { %v572_v2 = vmul.f32 %v540_v58, %v2321_v40  ;;  %v320_v58 = vpop.permute.xlu0 %319 }
 0x13d   : > { %v691_v60 = vpack.c.bf16 %v573_v52, %v572_v2 }
 0x13f   : > { %v295_v62 = vpop.permute.xlu1 %294  ;;  %1228 = vmatprep.mubr.bf16.mxu1 %v691_v60 }
 0x140   : > { %v332_v14 = vmul.f32 %v295_v62, %v2321_v40 }
 0x143   : > { %v300_v3 = vpop.permute.xlu1 %299 }
 0x144   : > { %v333_v11 = vmul.f32 %v300_v3, %v2326_v44  ;;  %v580_v3 = vpop.permute.xlu0 %579 }
 0x145   : > { %v642_v31 = vmul.f32 %v580_v3, %v2188_v55 }
 0x146   : > { %v688_v18 = vpack.c.bf16 %v333_v11, %v332_v14  ;;  %v337_v11 = vmul.f32 %v320_v58, %v2356_v53 }
 0x148   : > { %v464_v6 = vpop.permute.xlu1 %463  ;;  %1132 = vmatmul.mubr.bf16.gmra.mrb[20].mxu0 %v688_v18 }
 0x149   : > { %v493_v7 = vmul.f32 %v464_v6, %v2326_v44  ;;  %v1818_v6 = vld [vmem:[%s2043_s26 + $0x8] sm:$0xff] }
 0x14b   : > { %v690_v20 = vpack.c.bf16 %v493_v7, %v492_v4  ;;  %v1819_v7 = vld [vmem:[%s2043_s26] sm:$0xff] }
 0x14d   : > { %v388_v15 = vpop.permute.xlu1 %387  ;;  %1229 = vmatmul.mubr.bf16.gmra.mrb[20].mxu1 %v690_v20  ;;  %v663_v20 = vpack.c.bf16 %v1818_v6, %v1819_v7 }
 0x14e   : > { %v414_v24 = vmul.f32 %v388_v15, %v2341_v9 }
 0x150   : > { %v695_v16 = vpack.c.bf16 %v415_v21, %v414_v24  ;;  %v616_v21 = vpop.permute.xlu0 %615 }
 0x152   : > { %v548_v27 = vpop.permute.xlu1 %547  ;;  %1139 = vmatprep.mubr.bf16.mxu0 %v695_v16 }
 0x153   : > { %v574_v29 = vmul.f32 %v548_v27, %v2341_v9 }
 0x154   : > { %v592_v25 = vpop.permute.xlu0 %591 }
 0x156   : > { %v552_v0 = vpop.permute.xlu1 %551 }
 0x157   : > { %v575_v30 = vmul.f32 %v552_v0, %v2338_v8 }
 0x159   : > { %v697_v32 = vpack.c.bf16 %v575_v30, %v574_v29  ;;  %v687_v29 = vpack.c.bf16 %v2084_v28, %v2066_v12  ;;  %v693_v28 = vpack.c.bf16 %v2135_v48, %v2110_v46  ;;  %v699_v48 = vpack.c.bf16 %v2116_v47, %v2147_v50 }
 0x15a   : > { %v705_v47 = vpack.c.bf16 %v2152_v51, %v2140_v49 }
 0x15b   : > { %v310_v34 = vpop.permute.xlu1 %309  ;;  %1236 = vmatprep.mubr.bf16.mxu1 %v697_v32 }
 0x15c   : > { %v335_v63 = vmul.f32 %v310_v34, %v2338_v8  ;;  %v624_v34 = vpop.permute.xlu0 %623 }
 0x15e   : > { %v694_v35 = vpack.c.bf16 %v335_v63, %v334_v33  ;;  %v1820_v63 = vld [vmem:[%s2043_s26 + $0x10] sm:$0xff] }
 0x160   : > { %v468_v1 = vpop.permute.xlu1 %467  ;;  %1140 = vmatmul.mubr.bf16.gmra.mrb[24].mxu0 %v694_v35  ;;  %v669_v35 = vpack.c.bf16 %v2073_v17, %v1820_v63  ;;  %v1821_v17 = vld [vmem:[%s2043_s26 + $0x28] sm:$0xff] }
 0x161   : > { %v494_v41 = vmul.f32 %v468_v1, %v2341_v9 }
 0x163   : > { %v696_v42 = vpack.c.bf16 %v495_v5, %v494_v41  ;;  %v651_v41 = vmul.f32 %v616_v21, %v2309_v13  ;;  %v675_v13 = vpack.c.bf16 %v1821_v17, %v2098_v39  ;;  %v681_v39 = vpack.c.bf16 %v2103_v43, %v2079_v23 }
 0x165   : > { %v396_v26 = vpop.permute.xlu1 %395  ;;  %1237 = vmatmul.mubr.bf16.gmra.mrb[24].mxu1 %v696_v42 }
 0x166   : > { %v416_v57 = vmul.f32 %v396_v26, %v2353_v45  ;;  %v645_v26 = vmul.f32 %v592_v25, %v2218_v22 }
 0x169   : > { %v400_v54 = vpop.permute.xlu1 %399 }
 0x16a   : > { %v417_v52 = vmul.f32 %v400_v54, %v2356_v53 }
 0x16c   : > { %v701_v2 = vpack.c.bf16 %v417_v52, %v416_v57  ;;  %v653_v52 = vmul.f32 %v624_v34, %v2326_v44 }
 0x16e   : > { %v560_v60 = vpop.permute.xlu1 %559  ;;  %1147 = vmatprep.mubr.bf16.mxu0 %v701_v2 }
 0x16f   : > { %v577_v62 = vmul.f32 %v560_v60, %v2356_v53 }
 0x171   : > { %v703_v14 = vpack.c.bf16 %v577_v62, %v576_v37 }
 0x173   : > { %v315_v18 = vpop.permute.xlu1 %314  ;;  %1244 = vmatprep.mubr.bf16.mxu1 %v703_v14 }
 0x174   : > { %v336_v4 = vmul.f32 %v315_v18, %v2353_v45 }
 0x176   : > { %v700_v15 = vpack.c.bf16 %v337_v11, %v336_v4 }
 0x178   : > { %v476_v24 = vpop.permute.xlu1 %475  ;;  %1148 = vmatmul.mubr.bf16.gmra.mrb[28].mxu0 %v700_v15 }
 0x179   : > { %1518 = vmatprep.mubr.msk.bf16.mxu0 %vm1030_vm1, %v663_v20  ;;  %v496_v27 = vmul.f32 %v476_v24, %v2353_v45 }
 0x17c   : > { %v480_v16 = vpop.permute.xlu1 %479 }
 0x17d   : > { %v497_v0 = vmul.f32 %v480_v16, %v2356_v53 }
 0x17f   : > { %v702_v30 = vpack.c.bf16 %v497_v0, %v496_v27 }
 0x181   : > { %v584_v32 = vpop.permute.xlu1 %583  ;;  %1245 = vmatmul.mubr.bf16.gmra.mrb[28].mxu1 %v702_v30 }
 0x182   : > { %v643_v33 = vmul.f32 %v584_v32, %v2191_v56  ;;  %1522 = vmatprep.mubr.msk.bf16.mxu1 %vm1030_vm1, %v687_v29  ;;  %v600_v56 = vpop.permute.xlu0 %599 }
 0x183   : > { %v647_v2 = vmul.f32 %v600_v56, %v2241_v59 }
 0x184   : > { %v662_v1 = vpack.c.bf16 %v643_v33, %v642_v31 }
 0x185   : > { %v612_v5 = vpop.permute.xlu1 %611 }
 0x186   : > { %v650_v12 = vmul.f32 %v612_v5, %v2306_v10  ;;  %1286 = vmatmul.mubr.bf16.vlgmr.msra.gmra.mrb[32].mxu0 %v662_v1  ;;  %v632_v46 = vpop.permute.xlu0 %631 }
 0x187   : > { %1519 = vmatprep.mubr.msk.bf16.mxu0 %vm1030_vm1, %v669_v35  ;;  %v655_v62 = vmul.f32 %v632_v46, %v2338_v8 }
 0x188   : > { %v686_v55 = vpack.c.bf16 %v651_v41, %v650_v12 }
 0x189   : > { %v588_v42 = vpop.permute.xlu1 %587 }
 0x18a   : > { %v644_v54 = vmul.f32 %v588_v42, %v2212_v19  ;;  %1318 = vmatmul.mubr.bf16.vlgmr.msra.gmra.mrb[32].mxu1 %v686_v55  ;;  %v608_v44 = vpop.permute.xlu0 %607 }
 0x18b   : > { %1523 = vmatprep.mubr.msk.bf16.mxu1 %vm1030_vm1, %v693_v28 }
 0x18c   : > { %v668_v10 = vpack.c.bf16 %v645_v26, %v644_v54 }
 0x18d   : > { %v620_v57 = vpop.permute.xlu1 %619 }
 0x18e   : > { %v652_v58 = vmul.f32 %v620_v57, %v2321_v40  ;;  %1294 = vmatmul.mubr.bf16.gmra.mrb[36].mxu0 %v668_v10  ;;  %v640_v23 = vpop.permute.xlu0 %639 }
 0x18f   : > { %1520 = vmatprep.mubr.msk.bf16.mxu0 %vm1030_vm1, %v675_v13 }
 0x190   : > { %v692_v19 = vpack.c.bf16 %v653_v52, %v652_v58 }
 0x191   : > { %v596_v22 = vpop.permute.xlu1 %595 }
 0x192   : > { %v646_v60 = vmul.f32 %v596_v22, %v2244_v61  ;;  %1326 = vmatmul.mubr.bf16.gmra.mrb[36].mxu1 %v692_v19  ;;  %v649_v61 = vmul.f32 %v608_v44, %v2277_v36 }
 0x193   : > { %1524 = vmatprep.mubr.msk.bf16.mxu1 %vm1030_vm1, %v699_v48 }
 0x194   : > { %v674_v40 = vpack.c.bf16 %v647_v2, %v646_v60 }
 0x195   : > { %v628_v37 = vpop.permute.xlu1 %627 }
 0x196   : > { %v654_v3 = vmul.f32 %v628_v37, %v2341_v9  ;;  %1302 = vmatmul.mubr.bf16.gmra.mrb[40].mxu0 %v674_v40  ;;  %v657_v9 = vmul.f32 %v640_v23, %v2356_v53 }
 0x197   : > { %1521 = vmatprep.mubr.msk.bf16.mxu0 %vm1030_vm1, %v681_v39 }
 0x198   : > { %v698_v50 = vpack.c.bf16 %v655_v62, %v654_v3 }
 0x199   : > { %v604_v59 = vpop.permute.xlu1 %603 }
 0x19a   : > { %v648_v14 = vmul.f32 %v604_v59, %v2283_v38  ;;  %1334 = vmatmul.mubr.bf16.gmra.mrb[40].mxu1 %v698_v50 }
 0x19b   : > { %1525 = vmatprep.mubr.msk.bf16.mxu1 %vm1030_vm1, %v705_v47 }
 0x19c   : > { %v680_v43 = vpack.c.bf16 %v649_v61, %v648_v14 }
 0x19d   : > { %v636_v8 = vpop.permute.xlu1 %635 }
 0x19e   : > { %v656_v11 = vmul.f32 %v636_v8, %v2353_v45  ;;  %1310 = vmatmul.mubr.bf16.gmra.mrb[44].mxu0 %v680_v43 }
 0x1a0   : > { %v704_v18 = vpack.c.bf16 %v657_v9, %v656_v11  ;;  %v1612_v4 = vpop.f32.mrb[0].mxu1 }
 0x1a1   : > { %v1613_v49 = vpop.f32.mrb[1].mxu1 }
 0x1a2   : > { %v1614_v51 = vadd.f32 %v1613_v49, %v1612_v4  ;;  %v1615_v6 = vpop.f32.mrb[2].mxu1  ;;  %1342 = vmatmul.mubr.bf16.gmra.mrb[44].mxu1 %v704_v18 }
 0x1a3   : > { %v1616_v36 = vpop.f32.mrb[3].mxu1 }
 0x1a4   : > { %v1617_v7 = vadd.f32 %v1616_v36, %v1615_v6 }
 0x1ba   : > { %v1548_v38 = vpop.f32.mrb[0].mxu0 }
 0x1bb   : > { %v1549_v20 = vpop.f32.mrb[1].mxu0 }
 0x1bc   : > { %v1550_v15 = vadd.f32 %v1549_v20, %v1548_v38  ;;  %v1551_v21 = vpop.f32.mrb[2].mxu0  ;;  %v1618_v24 = vpop.f32.mrb[4].mxu1 }
 0x1bd   : > { %v1552_v16 = vpop.f32.mrb[3].mxu0  ;;  %v1619_v25 = vpop.f32.mrb[5].mxu1 }
 0x1be   : > { %v1553_v27 = vadd.f32 %v1552_v16, %v1551_v21  ;;  %v1620_v53 = vadd.f32 %v1619_v25, %v1618_v24  ;;  %v1621_v0 = vpop.f32.mrb[6].mxu1  ;;  %v2406_v45 = vadd.f32 %v1614_v51, %v1550_v15 }
 0x1bf   : > { %v1622_v29 = vpop.f32.mrb[7].mxu1 }
 0x1c0   : > { %v1623_v30 = vadd.f32 %v1622_v29, %v1621_v0  ;;  %v2408_v31 = vadd.f32 %v1617_v7, %v1553_v27 }
 0x1c2   : > { %v1554_v32 = vpop.f32.mrb[4].mxu0 }
 0x1c3   : > { %v1555_v33 = vpop.f32.mrb[5].mxu0 }
 0x1c4   : > { %v1556_v34 = vadd.f32 %v1555_v33, %v1554_v32  ;;  %v1557_v63 = vpop.f32.mrb[6].mxu0 }
 0x1c5   : > { %v1558_v35 = vpop.f32.mrb[7].mxu0 }
 0x1c6   : > { %v1559_v1 = vadd.f32 %v1558_v35, %v1557_v63  ;;  %v2410_v5 = vadd.f32 %v1620_v53, %v1556_v34 }
 0x1c8   : > { %v2412_v41 = vadd.f32 %v1623_v30, %v1559_v1 }
 0x1cf   : > { %v1560_v12 = vpop.f32.mrb[8].mxu0 }
 0x1d0   : > { %v1561_v28 = vpop.f32.mrb[9].mxu0 }
 0x1d1   : > { %v1562_v55 = vadd.f32 %v1561_v28, %v1560_v12  ;;  %v1563_v56 = vpop.f32.mrb[10].mxu0 }
 0x1d2   : > { %v1564_v42 = vpop.f32.mrb[11].mxu0 }
 0x1d3   : > { %v1565_v26 = vadd.f32 %v1564_v42, %v1563_v56 }
 0x1d4   : > { %v1624_v54 = vpop.f32.mrb[8].mxu1 }
 0x1d5   : > { %v1625_v17 = vpop.f32.mrb[9].mxu1 }
 0x1d6   : > { %v1626_v13 = vadd.f32 %v1625_v17, %v1624_v54  ;;  %v1627_v10 = vpop.f32.mrb[10].mxu1 }
 0x1d7   : > { %v1628_v57 = vpop.f32.mrb[11].mxu1 }
 0x1d8   : > { %v1629_v52 = vadd.f32 %v1628_v57, %v1627_v10  ;;  %v2414_v58 = vadd.f32 %v1626_v13, %v1562_v55 }
 0x1da   : > { %v2416_v46 = vadd.f32 %v1629_v52, %v1565_v26 }
 0x1e7   : > { %v1566_v48 = vpop.f32.mrb[12].mxu0 }
 0x1e8   : > { %v1567_v19 = vpop.f32.mrb[13].mxu0 }
 0x1e9   : > { %v1568_v22 = vadd.f32 %v1567_v19, %v1566_v48  ;;  %v1569_v2 = vpop.f32.mrb[14].mxu0 }
 0x1ea   : > { %v1570_v60 = vpop.f32.mrb[15].mxu0 }
 0x1eb   : > { %v1571_v39 = vadd.f32 %v1570_v60, %v1569_v2 }
 0x1ec   : > { %v1630_v40 = vpop.f32.mrb[12].mxu1 }
 0x1ed   : > { %v1631_v44 = vpop.f32.mrb[13].mxu1 }
 0x1ee   : > { %v1632_v37 = vadd.f32 %v1631_v44, %v1630_v40  ;;  %v1633_v62 = vpop.f32.mrb[14].mxu1 }
 0x1ef   : > { %v1634_v3 = vpop.f32.mrb[15].mxu1 }
 0x1f0   : > { %v1635_v47 = vadd.f32 %v1634_v3, %v1633_v62  ;;  %v2418_v50 = vadd.f32 %v1632_v37, %v1568_v22 }
 0x1f2   : > { %v2420_v59 = vadd.f32 %v1635_v47, %v1571_v39 }
 0x1ff   : > { %v1572_v61 = vpop.f32.mrb[16].mxu0 }
 0x200   : > { %v1573_v14 = vpop.f32.mrb[17].mxu0 }
 0x201   : > { %v1574_v23 = vadd.f32 %v1573_v14, %v1572_v61  ;;  %v1575_v43 = vpop.f32.mrb[18].mxu0 }
 0x202   : > { %v1576_v8 = vpop.f32.mrb[19].mxu0 }
 0x203   : > { %v1577_v9 = vadd.f32 %v1576_v8, %v1575_v43 }
 0x208   : > { %v1636_v11 = vpop.f32.mrb[16].mxu1 }
 0x209   : > { %v1637_v18 = vpop.f32.mrb[17].mxu1 }
 0x20a   : > { %v1638_v4 = vadd.f32 %v1637_v18, %v1636_v11  ;;  %v1639_v49 = vpop.f32.mrb[18].mxu1 }
 0x20b   : > { %v1640_v51 = vpop.f32.mrb[19].mxu1 }
 0x20c   : > { %v1641_v6 = vadd.f32 %v1640_v51, %v1639_v49  ;;  %v1223_v36 = vadd.f32 %v1638_v4, %v1574_v23 }
 0x20e   : > { %v1226_v7 = vadd.f32 %v1641_v6, %v1577_v9 }
 0x21b   : > { %v1578_v38 = vpop.f32.mrb[20].mxu0 }
 0x21c   : > { %v1579_v20 = vpop.f32.mrb[21].mxu0 }
 0x21d   : > { %v1580_v15 = vadd.f32 %v1579_v20, %v1578_v38  ;;  %v1581_v21 = vpop.f32.mrb[22].mxu0 }
 0x21e   : > { %v1582_v24 = vpop.f32.mrb[23].mxu0 }
 0x21f   : > { %v1583_v16 = vadd.f32 %v1582_v24, %v1581_v21 }
 0x220   : > { %v1642_v25 = vpop.f32.mrb[20].mxu1 }
 0x221   : > { %v1643_v27 = vpop.f32.mrb[21].mxu1 }
 0x222   : > { %v1644_v53 = vadd.f32 %v1643_v27, %v1642_v25  ;;  %v1645_v0 = vpop.f32.mrb[22].mxu1 }
 0x223   : > { %v1646_v29 = vpop.f32.mrb[23].mxu1 }
 0x224   : > { %v1647_v30 = vadd.f32 %v1646_v29, %v1645_v0  ;;  %v1231_v32 = vadd.f32 %v1644_v53, %v1580_v15 }
 0x226   : > { %v1234_v33 = vadd.f32 %v1647_v30, %v1583_v16 }
 0x233   : > { %v1584_v34 = vpop.f32.mrb[24].mxu0 }
 0x234   : > { %v1585_v63 = vpop.f32.mrb[25].mxu0 }
 0x235   : > { %v1586_v35 = vadd.f32 %v1585_v63, %v1584_v34  ;;  %v1587_v1 = vpop.f32.mrb[26].mxu0 }
 0x236   : > { %v1588_v12 = vpop.f32.mrb[27].mxu0 }
 0x237   : > { %v1589_v28 = vadd.f32 %v1588_v12, %v1587_v1 }
 0x238   : > { %v1648_v55 = vpop.f32.mrb[24].mxu1 }
 0x239   : > { %v1649_v56 = vpop.f32.mrb[25].mxu1 }
 0x23a   : > { %v1650_v42 = vadd.f32 %v1649_v56, %v1648_v55  ;;  %v1651_v26 = vpop.f32.mrb[26].mxu1 }
 0x23b   : > { %v1652_v54 = vpop.f32.mrb[27].mxu1 }
 0x23c   : > { %v1653_v17 = vadd.f32 %v1652_v54, %v1651_v26  ;;  %v1239_v13 = vadd.f32 %v1650_v42, %v1586_v35 }
 0x23e   : > { %v2422_v10 = vadd.f32 %v1653_v17, %v1589_v28 }
 0x24b   : > { %v1590_v57 = vpop.f32.mrb[28].mxu0 }
 0x24c   : > { %v1591_v52 = vpop.f32.mrb[29].mxu0 }
 0x24d   : > { %v1592_v48 = vadd.f32 %v1591_v52, %v1590_v57  ;;  %v1593_v19 = vpop.f32.mrb[30].mxu0 }
 0x24e   : > { %v1594_v22 = vpop.f32.mrb[31].mxu0 }
 0x24f   : > { %v1595_v2 = vadd.f32 %v1594_v22, %v1593_v19 }
 0x254   : > { %v1654_v60 = vpop.f32.mrb[28].mxu1 }
 0x255   : > { %v1655_v39 = vpop.f32.mrb[29].mxu1 }
 0x256   : > { %v1656_v40 = vadd.f32 %v1655_v39, %v1654_v60  ;;  %v1657_v44 = vpop.f32.mrb[30].mxu1 }
 0x257   : > { %v1658_v37 = vpop.f32.mrb[31].mxu1 }
 0x258   : > { %v1659_v62 = vadd.f32 %v1658_v37, %v1657_v44  ;;  %v1247_v3 = vadd.f32 %v1656_v40, %v1592_v48 }
 0x259   : > { %v1287_v47 = vpop.f32.mrb[32].mxu0 }
 0x25a   : > { %v1288_v61 = vadd.f32 %v1287_v47, %v2406_v45  ;;  %v1289_v14 = vpop.f32.mrb[33].mxu0  ;;  %v2428_v23 = vadd.f32 %v1659_v62, %v1595_v2 }
 0x25b   : > { %v1290_v43 = vpop.f32.mrb[34].mxu0 }
 0x25c   : > { %1350 = vst [vmem:[%s2430_s5] sm:$0xff] %v1288_v61  ;;  %v1291_v8 = vadd.f32 %v1290_v43, %v2408_v31  ;;  %v1292_v9 = vpop.f32.mrb[35].mxu0 }
 0x25d   : > { %v1319_v11 = vpop.f32.mrb[32].mxu1 }
 0x25e   : > { %1351 = vst [vmem:[%s2430_s5 + $0x8] sm:$0xff] %v1291_v8  ;;  %v1320_v18 = vadd.f32 %v1319_v11, %v1223_v36  ;;  %v1321_v45 = vpop.f32.mrb[33].mxu1 }
 0x25f   : > { %v1322_v4 = vpop.f32.mrb[34].mxu1 }
 0x260   : > { %1358 = vst [vmem:[%s2430_s5 + $0x40] sm:$0xff] %v1320_v18  ;;  %v1323_v49 = vadd.f32 %v1322_v4, %v1226_v7  ;;  %v1324_v51 = vpop.f32.mrb[35].mxu1 }
 0x261   : > { %v1295_v6 = vpop.f32.mrb[36].mxu0 }
 0x262   : > { %1359 = vst [vmem:[%s2430_s5 + $0x48] sm:$0xff] %v1323_v49  ;;  %v1296_v38 = vadd.f32 %v1295_v6, %v2410_v5  ;;  %v1297_v20 = vpop.f32.mrb[37].mxu0 }
 0x263   : > { %v1298_v15 = vpop.f32.mrb[38].mxu0 }
 0x264   : > { %1352 = vst [vmem:[%s2430_s5 + $0x10] sm:$0xff] %v1296_v38  ;;  %v1299_v31 = vadd.f32 %v1298_v15, %v2412_v41  ;;  %v1300_v21 = vpop.f32.mrb[39].mxu0 }
 0x265   : > { %v1327_v24 = vpop.f32.mrb[36].mxu1 }
 0x266   : > { %1353 = vst [vmem:[%s2430_s5 + $0x18] sm:$0xff] %v1299_v31  ;;  %v1328_v36 = vadd.f32 %v1327_v24, %v1231_v32  ;;  %v1329_v16 = vpop.f32.mrb[37].mxu1 }
 0x267   : > { %v1330_v25 = vpop.f32.mrb[38].mxu1 }
 0x268   : > { %1360 = vst [vmem:[%s2430_s5 + $0x50] sm:$0xff] %v1328_v36  ;;  %v1331_v7 = vadd.f32 %v1330_v25, %v1234_v33  ;;  %v1332_v27 = vpop.f32.mrb[39].mxu1 }
 0x269   : > { %v1303_v53 = vpop.f32.mrb[40].mxu0 }
 0x26a   : > { %1361 = vst [vmem:[%s2430_s5 + $0x58] sm:$0xff] %v1331_v7  ;;  %v1304_v5 = vadd.f32 %v1303_v53, %v2414_v58  ;;  %v1305_v0 = vpop.f32.mrb[41].mxu0 }
 0x26b   : > { %v1306_v29 = vpop.f32.mrb[42].mxu0 }
 0x26c   : > { %1354 = vst [vmem:[%s2430_s5 + $0x20] sm:$0xff] %v1304_v5  ;;  %v1307_v41 = vadd.f32 %v1306_v29, %v2416_v46  ;;  %v1308_v30 = vpop.f32.mrb[43].mxu0 }
 0x26d   : > { %v1335_v34 = vpop.f32.mrb[40].mxu1 }
 0x26e   : > { %1355 = vst [vmem:[%s2430_s5 + $0x28] sm:$0xff] %v1307_v41  ;;  %v1336_v32 = vadd.f32 %v1335_v34, %v1239_v13  ;;  %v1337_v63 = vpop.f32.mrb[41].mxu1 }
 0x26f   : > { %v1338_v33 = vpop.f32.mrb[42].mxu1 }
 0x270   : > { %1362 = vst [vmem:[%s2430_s5 + $0x60] sm:$0xff] %v1336_v32  ;;  %v1339_v35 = vadd.f32 %v1338_v33, %v2422_v10  ;;  %v1340_v1 = vpop.f32.mrb[43].mxu1 }
 0x271   : > { %v1311_v58 = vpop.f32.mrb[44].mxu0 }
 0x272   : > { %1363 = vst [vmem:[%s2430_s5 + $0x68] sm:$0xff] %v1339_v35  ;;  %v1312_v12 = vadd.f32 %v1311_v58, %v2418_v50  ;;  %v1313_v28 = vpop.f32.mrb[45].mxu0 }
 0x273   : > { %v1314_v46 = vpop.f32.mrb[46].mxu0 }
 0x274   : > { %1356 = vst [vmem:[%s2430_s5 + $0x30] sm:$0xff] %v1312_v12  ;;  %v1315_v55 = vadd.f32 %v1314_v46, %v2420_v59  ;;  %v1316_v56 = vpop.f32.mrb[47].mxu0 }
 0x275   : > { %v1343_v42 = vpop.f32.mrb[44].mxu1 }
 0x276   : > { %1357 = vst [vmem:[%s2430_s5 + $0x38] sm:$0xff] %v1315_v55  ;;  %v1344_v26 = vadd.f32 %v1343_v42, %v1247_v3  ;;  %v1345_v54 = vpop.f32.mrb[45].mxu1 }
 0x277   : > { %v1346_v17 = vpop.f32.mrb[46].mxu1 }
 0x278   : > { %1364 = vst [vmem:[%s2430_s5 + $0x70] sm:$0xff] %v1344_v26  ;;  %v1347_v50 = vadd.f32 %v1346_v17, %v2428_v23  ;;  %v1348_v59 = vpop.f32.mrb[47].mxu1 }
 0x27a   : > { %1365 = vst [vmem:[%s2430_s5 + $0x78] sm:$0xff] %v1347_v50 }
 0x27b   : > { %1863 = shalt.err (!%p1860_p7)
}
 0x27c   : > { %s1864_s24 = scalar_lea.hbm %s2459_s10, 2048  ;;  %s1868_s27 = scalar_lea.hbm %s2512_s3, 4096 }
 0x27d   : > { %p1865_p8 = scmp.ne.s32.totalorder %s2459_s10, %s1864_s24  ;;  %p1869_p1 = scmp.lt.u32.totalorder %s2459_s10, %s2512_s3 }
 0x27e   : > { %p1870_p0 = scmp.lt.u32.totalorder %s1868_s27, %s1864_s24  ;;  %p1872_p6 = scmp.lt.u32.totalorder %s1864_s24, %s2459_s10 }
 0x27f   : > { %p1866_p11 = pnand %p1865_p8, %p2523_p9 }
 0x280   : > { %p1871_p5 = por %p1870_p0, %p1869_p1 }
 0x281   : > { %p1867_p13 = pneg %p1866_p11 }
 0x282   : > { %p1873_p10 = por %p1872_p6, %p1871_p5 }
 0x284   : > { %p1874_p12 = pnand %p1873_p10, %p1867_p13 }
 0x286   : > { %1877 = shalt.err (!%p1874_p12)
}
 0x287   : > { %s1927_s30 = smov 128   ;;  %s1928_s4 = smov 8  }
 0x288   : > { %1682 = dma.vmem_to_hbm [thread:$0]  (%p2523_p9), %s2461_s7, 2048, %s2459_s10, %s2468_s16, %s1927_s30, %s1927_s30, %s1928_s4  }
 0x289 PF: > { %p1694_p2 = scmp.ge.s32.totalorder %s1916_s15, 2  ;;  %s1395_s5 = sand.u32 1, %s1904_s12  }
 0x28a   : > { %p2524_p3 = scmp.ne.s32.totalorder %s2517_s23, 0  ;;  %s1396_s6 = scalar_lea.sflag [#allocation4], %s1395_s5 }
 0x28c   : > { %p1689_p4 = pnand %p1694_p2, %p2524_p3 }
 0x28e   : > { %1899 = dma.done.wait (!%p1689_p4), %s1396_s6, 2048  }
 0x28f   : > { %1901 = vsyncadd (!%p1689_p4), %s1396_s6, 4294965248  ;;  %p14_p7 = scmp.ge.s32.totalorder %s1974_s18, 4   ;;  %s2525_s12 = smov %s1908_s13 }
 0x290   : > { %s2526_s13 = smov %s1912_s14  ;;  %s2527_s14 = smov %s1985_s21 }
 0x291   : > { %s2528_s15 = smov %s1974_s18  ;;  %16 = sbr.rel (!%p14_p7) target bundleno = 4 (0x4), region = 75 }
 0x298   :  { %1401 = vsyncpa [#allocation3], 1 }
 0x299   :  { %1403 = vsyncpa [#allocation3 + $0x1], 1 }
 0x29a   :  { %1404 = vsyncpa [#allocation4], 1 }
 0x29b   :  { %1406 = vsyncpa [#allocation4 + $0x1], 1 }

</bundles_post_ra>
